<compile_context>
chip_gen: v7x
topology: tpu7x:2x2x1
jax: 0.10.0
libtpu: 0.0.40
codegen_flags: <defaults>
</compile_context>

<pallas_src>
import math

import jax
import jax.numpy as jnp
from jax.experimental import pallas as pl
from jax.experimental.pallas import tpu as pltpu


def _gating_kernel(x_ref, w_ref, shift_ref, o_ref):
    # x_ref:     (TB, dim_p) bf16 -- full-K row block, j-invariant (VMEM-resident over j)
    # w_ref:     (dim_p, TN) bf16 -- BN-scale-folded weight column tile
    # shift_ref: (1,  TN)    f32  -- folded BatchNorm1d shift (eval mode)
    # o_ref:     (TB, TN)         -- activation tile
    tn = o_ref.shape[-1]
    gates = jnp.dot(x_ref[...], w_ref[...],
                    preferred_element_type=jnp.float32)       # MXU, f32 acc
    gates = jax.nn.sigmoid(gates + shift_ref[...])            # folded BN + EUP

    if x_ref.shape[-1] == tn:
        # Single column block (weight-resident case): no slicing needed.
        xn = x_ref[...]
    else:
        # Re-slice the already-resident x block for the gating multiply
        # (TN is a multiple of 128 in this branch -> aligned, unmasked loads).
        start = pl.multiple_of(pl.program_id(1) * tn, 128)
        xn = x_ref[:, pl.ds(start, tn)]

    o_ref[...] = (xn.astype(jnp.float32) * gates).astype(o_ref.dtype)


def _round_up(a, b):
    return (a + b - 1) // b * b


def _vmem_limit_bytes():
    cap = None
    try:
        cap = getattr(pltpu.get_tpu_info(), "vmem_capacity_bytes", None)
    except Exception:
        cap = None
    if not cap:
        cap = 64 * 1024 * 1024          # assume the smallest chip (v7x) if unknown
    # ~75% of physical VMEM: ~96 MiB on v5e/v6e (128 MiB), ~48 MiB on v7x (64 MiB).
    return (int(cap) * 3) // 4


def _pick_tiles(B, dim, vmem_limit):
    budget = vmem_limit - 8 * 1024 * 1024        # headroom for compiler scratch

    # ---- channel (N) tile ------------------------------------------------
    # Keep the whole folded weight VMEM-resident (single DMA for the entire
    # kernel) when its bf16 block fits ~budget/4 (i.e. double-buffered <= 1/2).
    if dim * dim * 2 <= budget // 4:
        TN, dim_p = dim, dim
    else:
        TN = 512
        while TN > 128 and 2 * (_round_up(dim, TN) * TN * 2) > budget // 2:
            TN //= 2                              # 512 -> 256 -> 128
        dim_p = _round_up(dim, TN)                # pad channels if needed (rare)

    # ---- batch (M) tile ---------------------------------------------------
    # Arithmetic intensity on the weight stream ~ TB flops/byte, so grow TB
    # with the remaining VMEM.
    tb_target = 2048 if dim_p <= 512 else (1024 if budget > 64 * 1024 * 1024 else 512)
    w_buffers = 2 * dim_p * TN * 2                                  # bf16, x2 bufs
    per_row = 2 * dim_p * 2 + 2 * TN * 4                           # x(bf16)+out(f32), x2 bufs
    tb_vmem = max(8, (budget - w_buffers) // per_row)
    TB = min(tb_target, tb_vmem)

    if B <= TB:
        TB, Bp = B, B                             # whole batch in one row block, no pad
    else:
        # Balance the row blocks; pad at most 7 rows per block (often zero).
        nblk = -(-B // TB)
        TB = _round_up(-(-B // nblk), 8)
        Bp = TB * nblk

    return TB, Bp, TN, dim_p


@jax.jit
def gating_context(x, gating_weights, bn_gamma, bn_beta, bn_mean, bn_var,
                   eps=1e-5):
    """x: (B, dim). Returns (B, dim) activation = x * sigmoid(BN(x @ W))."""
    B, dim = x.shape
    vmem_limit = _vmem_limit_bytes()
    TB, Bp, TN, dim_p = _pick_tiles(B, dim, vmem_limit)

    # Fold eval-mode BatchNorm1d into the weight columns + a per-channel shift.
    inv_std = jax.lax.rsqrt(bn_var.astype(jnp.float32) + eps)
    scale = bn_gamma.astype(jnp.float32) * inv_std                          # (dim,)
    shift = bn_beta.astype(jnp.float32) - bn_mean.astype(jnp.float32) * scale
    # bf16 weights: 2x MXU throughput, half the weight DMA / VMEM footprint.
    w_folded = (gating_weights.astype(jnp.float32) * scale[None, :]
                ).astype(jnp.bfloat16)

    # Single bf16 copy of x feeds both the MXU matmul and the gating multiply.
    x_bf16 = x.astype(jnp.bfloat16)

    if Bp != B or dim_p != dim:
        # Zero padding: padded rows/cols produce zeros and are sliced off below
        # (XLA fuses this with the bf16 cast, so it is not an extra HBM pass).
        x_bf16 = jnp.pad(x_bf16, ((0, Bp - B), (0, dim_p - dim)))
    if dim_p != dim:
        w_folded = jnp.pad(w_folded, ((0, dim_p - dim), (0, dim_p - dim)))
        shift = jnp.pad(shift, (0, dim_p - dim))
    shift = shift.reshape(1, dim_p)

    grid = (Bp // TB, dim_p // TN)

    out = pl.pallas_call(
        _gating_kernel,
        out_shape=jax.ShapeDtypeStruct((Bp, dim_p), x.dtype),
        grid_spec=pltpu.PrefetchScalarGridSpec(
            num_scalar_prefetch=0,
            grid=grid,
            in_specs=[
                # full-K x rows: j-invariant index_map -> stays VMEM-resident
                pl.BlockSpec((TB, dim_p), lambda i, j: (i, 0)),
                # BN-folded weight column tile (bf16); (0,0) constant when TN==dim
                pl.BlockSpec((dim_p, TN), lambda i, j: (0, j)),
                # BN shift for this column tile
                pl.BlockSpec((1, TN), lambda i, j: (0, j)),
            ],
            out_specs=pl.BlockSpec((TB, TN), lambda i, j: (i, j)),
        ),
        compiler_params=pltpu.CompilerParams(
            dimension_semantics=("parallel", "parallel"),
            vmem_limit_bytes=vmem_limit,
        ),
    )(x_bf16, w_folded, shift)

    if Bp != B or dim_p != dim:
        out = out[:B, :dim]
    return out


def reference(x, w, gamma, beta, mean, var, eps=1e-5):
    gates = x @ w
    gates = (gates - mean) / jnp.sqrt(var + eps) * gamma + beta
    gates = jax.nn.sigmoid(gates)
    return x * gates


if __name__ == "__main__":
    B, dim = 8, 128

    key = jax.random.PRNGKey(0)
    k_x, k_w, k_g, k_b, k_m, k_v = jax.random.split(key, 6)

    x = jax.random.normal(k_x, (B, dim), dtype=jnp.float32)
    # nn.Parameter(torch.randn(dim, dim) * 1/sqrt(dim))
    gating_weights = (jax.random.normal(k_w, (dim, dim), dtype=jnp.float32)
                      / math.sqrt(dim))
    # BatchNorm1d(dim) parameters, eval mode; deterministic non-trivial init.
    bn_gamma = 1.0 + 0.1 * jax.random.normal(k_g, (dim,), dtype=jnp.float32)
    bn_beta = 0.1 * jax.random.normal(k_b, (dim,), dtype=jnp.float32)
    bn_mean = 0.05 * jax.random.normal(k_m, (dim,), dtype=jnp.float32)
    bn_var = jnp.abs(1.0 + 0.1 * jax.random.normal(k_v, (dim,), dtype=jnp.float32))

    out = gating_context(x, gating_weights, bn_gamma, bn_beta, bn_mean, bn_var)
    out = jax.block_until_ready(out)

    ref = reference(x, gating_weights, bn_gamma, bn_beta, bn_mean, bn_var)
    assert out.shape == (B, dim)
    # bf16 x / bf16 matmul inside the kernel -> relaxed tolerance vs f32 reference.
    assert jnp.allclose(out, ref, atol=2e-2, rtol=2e-2), "mismatch vs reference"

    print("KERNEL_OK")
</pallas_src>

<mosaic_0001>
module attributes {stable_mosaic.version = 11 : i64} {
  func.func @_gating_kernel(%arg0: i32, %arg1: i32, %arg2: memref<8x128xbf16, #tpu.memory_space<vmem>>, %arg3: memref<128x128xbf16, #tpu.memory_space<vmem>>, %arg4: memref<1x128xf32, #tpu.memory_space<vmem>>, %arg5: memref<8x128xf32, #tpu.memory_space<vmem>>) attributes {dimension_semantics = [#tpu.dimension_semantics<parallel>, #tpu.dimension_semantics<parallel>], iteration_bounds = array<i64: 1, 1>, scalar_prefetch = 0 : i64, scratch_operands = 0 : i64, tpu.core_type = #tpu.core_type<tc>, window_params = [{transform_indices = @transform_0, window_bounds = array<i64: 8, 128>}, {transform_indices = @transform_1, window_bounds = array<i64: 128, 128>}, {transform_indices = @transform_2, window_bounds = array<i64: 1, 128>}, {transform_indices = @transform_3, window_bounds = array<i64: 8, 128>}]} {
    %c0 = arith.constant 0 : index
    %c0_0 = arith.constant 0 : index
    %0 = vector.load %arg2[%c0, %c0_0] : memref<8x128xbf16, #tpu.memory_space<vmem>>, vector<8x128xbf16>
    %c0_1 = arith.constant 0 : index
    %c0_2 = arith.constant 0 : index
    %1 = vector.load %arg3[%c0_1, %c0_2] : memref<128x128xbf16, #tpu.memory_space<vmem>>, vector<128x128xbf16>
    %cst = arith.constant dense<0.000000e+00> : vector<8x128xf32>
    %2 = tpu.matmul %0, %1, %cst {dimension_numbers = #tpu.dot_dimension_numbers<[1], [0], [0], [1], [0, 0, 1, 1], [], []>} : vector<8x128xbf16>, vector<128x128xbf16>, vector<8x128xf32> -> vector<8x128xf32>
    %c0_3 = arith.constant 0 : index
    %c0_4 = arith.constant 0 : index
    %3 = vector.load %arg4[%c0_3, %c0_4] : memref<1x128xf32, #tpu.memory_space<vmem>>, vector<1x128xf32>
    %4 = vector.broadcast %3 : vector<1x128xf32> to vector<8x128xf32>
    %5 = arith.addf %2, %4 : vector<8x128xf32>
    %6 = arith.negf %5 : vector<8x128xf32>
    %7 = math.exp %6 : vector<8x128xf32>
    %cst_5 = arith.constant 1.000000e+00 : f32
    %8 = vector.broadcast %cst_5 : f32 to vector<8x128xf32>
    %9 = arith.addf %8, %7 : vector<8x128xf32>
    %10 = arith.divf %8, %9 : vector<8x128xf32>
    %c0_6 = arith.constant 0 : index
    %c0_7 = arith.constant 0 : index
    %11 = vector.load %arg2[%c0_6, %c0_7] : memref<8x128xbf16, #tpu.memory_space<vmem>>, vector<8x128xbf16>
    %12 = arith.extf %11 : vector<8x128xbf16> to vector<8x128xf32>
    %13 = arith.mulf %12, %10 : vector<8x128xf32>
    %c0_8 = arith.constant 0 : index
    %c0_9 = arith.constant 0 : index
    %14 = vector.load %arg5[%c0_8, %c0_9] : memref<8x128xf32, #tpu.memory_space<vmem>>, vector<8x128xf32>
    tpu.vector_store %arg5[%c0_8, %c0_9], %13 {strides = array<i32>} : memref<8x128xf32, #tpu.memory_space<vmem>>, vector<8x128xf32>,
    return
  }
  func.func @transform_0(%arg0: i32, %arg1: i32) -> (i32, i32) {
    %c0_i32 = arith.constant 0 : i32
    %c0_i32_0 = arith.constant 0 : i32
    return %arg0, %c0_i32 : i32, i32
  }
  func.func @transform_1(%arg0: i32, %arg1: i32) -> (i32, i32) {
    %c0_i32 = arith.constant 0 : i32
    %c0_i32_0 = arith.constant 0 : i32
    return %c0_i32, %arg1 : i32, i32
  }
  func.func @transform_2(%arg0: i32, %arg1: i32) -> (i32, i32) {
    %c0_i32 = arith.constant 0 : i32
    %c0_i32_0 = arith.constant 0 : i32
    return %c0_i32, %arg1 : i32, i32
  }
  func.func @transform_3(%arg0: i32, %arg1: i32) -> (i32, i32) {
    %c0_i32 = arith.constant 0 : i32
    return %arg0, %arg1 : i32, i32
  }
}

</mosaic_0001>

<bundles_post_ra>
// kernel: gating_context.1
= control target key start
LH: loop header
LB: loop body
LE: loop exit
PB: predicated region body
PF: predicated region fallthrough
CT: control target
= control target key end

     0   :  { %v229_v1 = vmov 0.0   ;;  %vm230_vm0 = vmmov 0   ;;  %s294_s0 = inlined_call_operand.vmem [shape: bf16[8,128], index: 0, kind: input, shape index: {}]   ;;  %s295_s1 = inlined_call_operand.vmem [shape: bf16[128,128], index: 1, kind: input, shape index: {}]   ;;  %s296_s2 = inlined_call_operand.vmem [shape: f32[1,128], index: 2, kind: input, shape index: {}]   ;;  %s297_s3 = inlined_call_operand.hbm [shape: f32[8,128], index: 3, kind: output, shape index: {}]  }
   0x1   :  { %v193_v0 = vld [vmem:[%s295_s1] sm:$0xff]   ;;  %170 = vmatprep.subr.bf16.mxu0 %v229_v1  ;;  %v194_v2 = vld [vmem:[%s295_s1 + $0x8] sm:$0xff]   ;;  %186 = vmatprep.mubr.msk.bf16.mxu0 %vm230_vm0, %v229_v1  ;;  %v195_v3 = vld [vmem:[%s295_s1 + $0x10] sm:$0xff]  }
   0x2   :  { %171 = vmatpush3.bf16.msra.mxu0 %v193_v0 }
   0x3   :  { %172 = vmatprep.subr.bf16.mxu0 %v229_v1 }
   0x6   :  { %173 = vmatpush3.bf16.msra.mxu0 %v194_v2 }
   0x7   :  { %174 = vmatprep.subr.bf16.mxu0 %v229_v1 }
   0x8   :  { %8 = vsyncpa [#allocation3], 0  ;;  %v196_v4 = vld [vmem:[%s295_s1 + $0x18] sm:$0xff]   ;;  %v197_v5 = vld [vmem:[%s295_s1 + $0x20] sm:$0xff]  }
   0x9   :  { %v198_v6 = vld [vmem:[%s295_s1 + $0x28] sm:$0xff]   ;;  %v199_v7 = vld [vmem:[%s295_s1 + $0x30] sm:$0xff]   ;;  %v200_v8 = vld [vmem:[%s295_s1 + $0x38] sm:$0xff]   ;;  %s231_s1 = smov [#allocation2]  }
   0xa   :  { %175 = vmatpush3.bf16.msra.mxu0 %v195_v3  ;;  %v16_v9 = vld [vmem:[%s294_s0] sm:$0xf]  ;;  %s143_s5 = sshll.u32 %s231_s1, 4  ;;  %s144_s5 = int_to_ptr.vmem [resolvable:$true] %s143_s5 }
   0xb   :  { %176 = vmatprep.subr.bf16.mxu0 %v229_v1  ;;  %v151_v10 = vld [vmem:[%s296_s2] ss:$0 sm:$0xff]  ;;  %v134_v19 = vunpack.c.l.bf16 %v16_v9  ;;  %s205_s0 = scalar_lea.vmem %s144_s5, 128  ;;  %p210_p1 = scmp.lt.s32.totalorder %s144_s5, %s144_s5 }
   0xc   :  { %p206_p0 = scmp.ne.s32.totalorder %s144_s5, %s205_s0  ;;  %p211_p2 = scmp.lt.s32.totalorder %s205_s0, %s205_s0 }
   0xe   :  { %177 = vmatpush3.bf16.msra.mxu0 %v196_v4  ;;  %p212_p3 = por %p211_p2, %p210_p1 }
   0xf   :  { %178 = vmatprep.subr.bf16.mxu0 %v229_v1 }
  0x10   :  { %p213_p4 = pnand %p212_p3, %p206_p0 }
  0x12   :  { %179 = vmatpush3.bf16.msra.mxu0 %v197_v5 }
  0x13   :  { %180 = vmatprep.subr.bf16.mxu0 %v229_v1 }
  0x16   :  { %181 = vmatpush3.bf16.msra.mxu0 %v198_v6 }
  0x17   :  { %182 = vmatprep.subr.bf16.mxu0 %v229_v1 }
  0x1a   :  { %183 = vmatpush3.bf16.msra.mxu0 %v199_v7 }
  0x1b   :  { %184 = vmatprep.subr.bf16.mxu0 %v229_v1 }
  0x1e   :  { %185 = vmatpush3.bf16.msra.mxu0 %v200_v8 }
  0x21   :  { %187 = vmatmul.mubr.bf16.vlgmr.msra.gmra.mrb[0].mxu0 %v16_v9 }
  0xf4   :  { %v122_v11 = vpop.f32.mrb[0].mxu0 }
  0xf5   :  { %v123_v12 = vadd.f32 %v151_v10, %v122_v11  ;;  %v188_v13 = vpop.f32.mrb[1].mxu0 }
  0xf6   :  { %v125_v14 = vpop.f32.mrb[2].mxu0 }
  0xf7   :  { %v160_v15 = vmul.f32 -1.442695, %v123_v12  ;;  %v189_v16 = vpop.f32.mrb[3].mxu0 }
  0xf9   :  { %201 = vpow2.f32 %v160_v15 }
 0x103   :  { %v202_v17 = vpop.eup %201 }
 0x104   :  { %v131_v18 = vadd.f32 1.0, %v202_v17 }
 0x106   :  { %203 = vrcp.f32 %v131_v18 }
 0x110   :  { %v204_v20 = vpop.eup %203 }
 0x111   :  { %v135_v21 = vmul.f32 %v204_v20, %v134_v19 }
 0x113   :  { %136 = vst [vmem:[#allocation2] sm:$0xff] %v135_v21 }
 0x114   :  { %216 = shalt.err (!%p213_p4)
}
 0x115   :  { %s217_s7 = scalar_lea.hbm %s297_s3, 128 }
 0x116   :  { %p218_p5 = scmp.ne.s32.totalorder %s297_s3, %s217_s7  ;;  %p221_p6 = scmp.lt.u32.totalorder %s217_s7, %s297_s3 }
 0x118   :  { %p223_p7 = pnand %p221_p6, %p218_p5 }
 0x11a   :  { %226 = shalt.err (!%p223_p7)
}
 0x11b   :  { %146 = dma.vmem_to_hbm [thread:$0]  %s144_s5, 128, %s297_s3, [#allocation3]  }
 0x11c   :  { %227 = dma.done.wait [#allocation3], 128  }
 0x11d   :  { %228 = vsyncadd [#allocation3], 4294967168 }
 0x11e   :  { %150 = vsyncpa [#allocation3], 1 }

</bundles_post_ra>
